<compile_context>
chip_gen: v5e
topology: v5e:2x2
jax: 0.10.0
libtpu: 0.0.40
codegen_flags: <defaults>
</compile_context>

<pallas_src>
import functools

import jax
import jax.numpy as jnp
from jax.experimental import pallas as pl
from jax.experimental.pallas import tpu as pltpu


_HID1, _HID2 = 128, 64


def _round_up(n, m):
    return ((n + m - 1) // m) * m


def _tpu_kind():
    """Best-effort chip-generation string ('' if it cannot be determined)."""
    try:
        return jax.devices()[0].device_kind.lower()
    except Exception:
        return ""


def _state_encoder_kernel(x_ref, w1_ref, b1_ref, w2_ref, b2_ref,
                          w3_ref, b3_ref, o_ref):
    """Fused 3-layer MLP on one batch tile; weights/biases are full blocks."""
    compute_dtype = w1_ref.dtype            # f32 or bf16; accumulation is f32

    # Layer 1: [TB, s_dim] @ [s_dim, 128] -> +b -> ReLU
    # Cast the input tile to the weight dtype so a mixed f32-state/bf16-weight
    # call still takes the full-rate bf16 MXU path and matches the reference.
    x = x_ref[...].astype(compute_dtype)
    h = jnp.dot(x, w1_ref[...], preferred_element_type=jnp.float32)
    h = jnp.maximum(h + b1_ref[...], 0.0)

    # Layer 2: [TB, 128] @ [128, 64] -> +b -> ReLU
    h = jnp.dot(h.astype(compute_dtype), w2_ref[...],
                preferred_element_type=jnp.float32)
    h = jnp.maximum(h + b2_ref[...], 0.0)

    # Layer 3 (head): [TB, 64] @ [64, f_dim] -> +b
    y = jnp.dot(h.astype(compute_dtype), w3_ref[...],
                preferred_element_type=jnp.float32) + b3_ref[...]
    o_ref[...] = y.astype(o_ref.dtype)


@functools.partial(jax.jit, static_argnames=("block_b", "out_dtype"))
def state_encoder_forward(state, params, block_b=None, out_dtype=None):
    """Pallas implementation of StateEncoder.forward(state) -> [B, f_dim]."""
    w1, b1, w2, b2, w3, b3 = params
    b, s_dim = state.shape
    f_dim = w3.shape[1]
    out_dtype = jnp.float32 if out_dtype is None else out_dtype

    kind = _tpu_kind()
    is_v7x = "v7" in kind
    # v5e (and unknown chips, conservatively) have a 16 MiB default scoped VMEM.
    small_vmem = (not kind) or ("v5e" in kind) or ("v5" in kind and "lite" in kind)

    # Batch tile selection: big tiles amortize the ~0.35 us per-grid-step
    # pipeline overhead (this kernel is overhead/HBM-bound, not MXU-bound).
    if block_b is None:
        block_b = 4096 if (b >= 4096 and not small_vmem) else 2048
    block_b_eff = min(block_b, _round_up(b, 8))

    # v7x only: 2 TensorCores per chip.  Force >=2 "parallel" grid steps, keep
    # the step count even and the tiles balanced so both TCs get equal work.
    # v5e/v6e have a single TC, so splitting would be pure per-step overhead.
    if is_v7x and b >= 256:
        grid_n = max(pl.cdiv(b, block_b_eff), 2)
        if grid_n % 2:
            grid_n += 1
        block_b_eff = _round_up(pl.cdiv(b, grid_n), 8)

    grid = (pl.cdiv(b, block_b_eff),)

    # Only needed if a caller forces a >2048 tile on a small-VMEM chip.
    vmem_limit = (32 << 20) if (small_vmem and block_b_eff > 2048) else None

    # Biases as [1, N] f32 rows so they broadcast over the batch tile.
    b1r = b1.reshape(1, -1).astype(jnp.float32)
    b2r = b2.reshape(1, -1).astype(jnp.float32)
    b3r = b3.reshape(1, -1).astype(jnp.float32)

    full = lambda i: (0, 0)   # weights/biases: same (full) block every step

    out = pl.pallas_call(
        _state_encoder_kernel,
        out_shape=jax.ShapeDtypeStruct((b, f_dim), out_dtype),
        grid_spec=pltpu.PrefetchScalarGridSpec(
            num_scalar_prefetch=0,
            grid=grid,
            in_specs=[
                pl.BlockSpec((block_b_eff, s_dim), lambda i: (i, 0)),   # x tile
                pl.BlockSpec(w1.shape, full),
                pl.BlockSpec(b1r.shape, full),
                pl.BlockSpec(w2.shape, full),
                pl.BlockSpec(b2r.shape, full),
                pl.BlockSpec(w3.shape, full),
                pl.BlockSpec(b3r.shape, full),
            ],
            out_specs=pl.BlockSpec((block_b_eff, f_dim), lambda i: (i, 0)),
        ),
        compiler_params=pltpu.CompilerParams(
            dimension_semantics=("parallel",),
            vmem_limit_bytes=vmem_limit),
    )(state, w1, b1r, w2, b2r, w3, b3r)

    return out


def init_state_encoder_params(key, s_dim, f_dim):
    """nn.Linear default init (uniform +-1/sqrt(fan_in)); weights stored [in, out]."""
    dims = [(s_dim, _HID1), (_HID1, _HID2), (_HID2, f_dim)]
    params = []
    for din, dout in dims:
        key, kw, kb = jax.random.split(key, 3)
        bound = 1.0 / (din ** 0.5)
        w = jax.random.uniform(kw, (din, dout), jnp.float32, -bound, bound)
        bb = jax.random.uniform(kb, (dout,), jnp.float32, -bound, bound)
        params.extend([w, bb])
    return tuple(params)


def cast_params(params, dtype):
    """One-time cast of weights to the kernel compute dtype (e.g. bf16).

    Biases stay f32 (they are added to the f32 accumulator inside the kernel)."""
    w1, b1, w2, b2, w3, b3 = params
    return (w1.astype(dtype), b1, w2.astype(dtype), b2, w3.astype(dtype), b3)


def state_encoder_reference(state, params):
    """Pure-JAX reference that mirrors the kernel's dtype behavior."""
    w1, b1, w2, b2, w3, b3 = params
    cdt = w1.dtype
    h = jnp.dot(state.astype(cdt), w1, preferred_element_type=jnp.float32)
    h = jnp.maximum(h + b1.astype(jnp.float32), 0.0)
    h = jnp.dot(h.astype(cdt), w2, preferred_element_type=jnp.float32)
    h = jnp.maximum(h + b2.astype(jnp.float32), 0.0)
    y = jnp.dot(h.astype(cdt), w3, preferred_element_type=jnp.float32)
    return y + b3.astype(jnp.float32)


if __name__ == "__main__":
    s_dim, f_dim, batch = 16, 32, 72

    key = jax.random.PRNGKey(0)
    kp, ks = jax.random.split(key)
    params = init_state_encoder_params(kp, s_dim, f_dim)
    state = jax.random.normal(ks, (batch, s_dim), jnp.float32)

    y_ref = state_encoder_reference(state, params)

    # --- f32 path, auto tile (single grid step at this size) ---
    y = jax.block_until_ready(state_encoder_forward(state, params))
    assert y.shape == (batch, f_dim), y.shape
    assert jnp.allclose(y, y_ref, atol=1e-4, rtol=1e-4), (
        f"f32 max abs err {jnp.max(jnp.abs(y - y_ref))}")

    # --- multi-step grid with a ragged last tile (no padding anywhere) ---
    y_blk = jax.block_until_ready(
        state_encoder_forward(state, params, block_b=32))   # grid=3, tail=8 rows
    assert jnp.allclose(y_blk, y_ref, atol=1e-4, rtol=1e-4), (
        f"ragged max abs err {jnp.max(jnp.abs(y_blk - y_ref))}")

    # --- mixed path: f32 state + bf16 weights (in-kernel cast, full bf16 MXU) ---
    params_bf16 = cast_params(params, jnp.bfloat16)
    y_mixed = jax.block_until_ready(state_encoder_forward(state, params_bf16))
    y_mixed_ref = state_encoder_reference(state, params_bf16)
    assert jnp.allclose(y_mixed, y_mixed_ref, atol=2e-2, rtol=2e-2), (
        f"mixed max abs err {jnp.max(jnp.abs(y_mixed - y_mixed_ref))}")

    # --- bf16 in, bf16 out (halves HBM writeback), f32 MXU accumulation ---
    state_bf16 = state.astype(jnp.bfloat16)
    y_bf16 = jax.block_until_ready(
        state_encoder_forward(state_bf16, params_bf16, out_dtype=jnp.bfloat16))
    assert y_bf16.dtype == jnp.bfloat16, y_bf16.dtype
    y_bf16_ref = state_encoder_reference(state_bf16, params_bf16)
    assert jnp.allclose(y_bf16.astype(jnp.float32), y_bf16_ref,
                        atol=5e-2, rtol=5e-2), (
        f"bf16-out max abs err "
        f"{jnp.max(jnp.abs(y_bf16.astype(jnp.float32) - y_bf16_ref))}")

    print("KERNEL_OK")
</pallas_src>

<mosaic_0001>
module attributes {stable_mosaic.version = 11 : i64} {
  func.func @_state_encoder_kernel(%arg0: i32, %arg1: memref<72x16xf32, #tpu.memory_space<vmem>>, %arg2: memref<16x128xf32, #tpu.memory_space<vmem>>, %arg3: memref<1x128xf32, #tpu.memory_space<vmem>>, %arg4: memref<128x64xf32, #tpu.memory_space<vmem>>, %arg5: memref<1x64xf32, #tpu.memory_space<vmem>>, %arg6: memref<64x32xf32, #tpu.memory_space<vmem>>, %arg7: memref<1x32xf32, #tpu.memory_space<vmem>>, %arg8: memref<72x32xf32, #tpu.memory_space<vmem>>) attributes {dimension_semantics = [#tpu.dimension_semantics<parallel>], iteration_bounds = array<i64: 1>, scalar_prefetch = 0 : i64, scratch_operands = 0 : i64, tpu.core_type = #tpu.core_type<tc>, window_params = [{transform_indices = @transform_0, window_bounds = array<i64: 72, 16>}, {pipeline_mode = #tpu.pipeline_mode<synchronous>, transform_indices = @transform_1, window_bounds = array<i64: 16, 128>}, {pipeline_mode = #tpu.pipeline_mode<synchronous>, transform_indices = @transform_2, window_bounds = array<i64: 1, 128>}, {pipeline_mode = #tpu.pipeline_mode<synchronous>, transform_indices = @transform_3, window_bounds = array<i64: 128, 64>}, {pipeline_mode = #tpu.pipeline_mode<synchronous>, transform_indices = @transform_4, window_bounds = array<i64: 1, 64>}, {pipeline_mode = #tpu.pipeline_mode<synchronous>, transform_indices = @transform_5, window_bounds = array<i64: 64, 32>}, {pipeline_mode = #tpu.pipeline_mode<synchronous>, transform_indices = @transform_6, window_bounds = array<i64: 1, 32>}, {transform_indices = @transform_7, window_bounds = array<i64: 72, 32>}]} {
    %c0 = arith.constant 0 : index
    %c0_0 = arith.constant 0 : index
    %0 = vector.load %arg1[%c0, %c0_0] : memref<72x16xf32, #tpu.memory_space<vmem>>, vector<72x16xf32>
    %c0_1 = arith.constant 0 : index
    %c0_2 = arith.constant 0 : index
    %1 = vector.load %arg2[%c0_1, %c0_2] : memref<16x128xf32, #tpu.memory_space<vmem>>, vector<16x128xf32>
    %cst = arith.constant dense<0.000000e+00> : vector<72x128xf32>
    %2 = tpu.matmul %0, %1, %cst {dimension_numbers = #tpu.dot_dimension_numbers<[1], [0], [0], [1], [0, 0, 1, 1], [], []>} : vector<72x16xf32>, vector<16x128xf32>, vector<72x128xf32> -> vector<72x128xf32>
    %c0_3 = arith.constant 0 : index
    %c0_4 = arith.constant 0 : index
    %3 = vector.load %arg3[%c0_3, %c0_4] : memref<1x128xf32, #tpu.memory_space<vmem>>, vector<1x128xf32>
    %4 = vector.broadcast %3 : vector<1x128xf32> to vector<72x128xf32>
    %5 = arith.addf %2, %4 : vector<72x128xf32>
    %cst_5 = arith.constant 0.000000e+00 : f32
    %6 = vector.broadcast %cst_5 : f32 to vector<72x128xf32>
    %7 = arith.maximumf %5, %6 : vector<72x128xf32>
    %c0_6 = arith.constant 0 : index
    %c0_7 = arith.constant 0 : index
    %8 = vector.load %arg4[%c0_6, %c0_7] : memref<128x64xf32, #tpu.memory_space<vmem>>, vector<128x64xf32>
    %cst_8 = arith.constant dense<0.000000e+00> : vector<72x64xf32>
    %9 = tpu.matmul %7, %8, %cst_8 {dimension_numbers = #tpu.dot_dimension_numbers<[1], [0], [0], [1], [0, 0, 1, 1], [], []>} : vector<72x128xf32>, vector<128x64xf32>, vector<72x64xf32> -> vector<72x64xf32>
    %c0_9 = arith.constant 0 : index
    %c0_10 = arith.constant 0 : index
    %10 = vector.load %arg5[%c0_9, %c0_10] : memref<1x64xf32, #tpu.memory_space<vmem>>, vector<1x64xf32>
    %11 = vector.broadcast %10 : vector<1x64xf32> to vector<72x64xf32>
    %12 = arith.addf %9, %11 : vector<72x64xf32>
    %cst_11 = arith.constant 0.000000e+00 : f32
    %13 = vector.broadcast %cst_11 : f32 to vector<72x64xf32>
    %14 = arith.maximumf %12, %13 : vector<72x64xf32>
    %c0_12 = arith.constant 0 : index
    %c0_13 = arith.constant 0 : index
    %15 = vector.load %arg6[%c0_12, %c0_13] : memref<64x32xf32, #tpu.memory_space<vmem>>, vector<64x32xf32>
    %cst_14 = arith.constant dense<0.000000e+00> : vector<72x32xf32>
    %16 = tpu.matmul %14, %15, %cst_14 {dimension_numbers = #tpu.dot_dimension_numbers<[1], [0], [0], [1], [0, 0, 1, 1], [], []>} : vector<72x64xf32>, vector<64x32xf32>, vector<72x32xf32> -> vector<72x32xf32>
    %c0_15 = arith.constant 0 : index
    %c0_16 = arith.constant 0 : index
    %17 = vector.load %arg7[%c0_15, %c0_16] : memref<1x32xf32, #tpu.memory_space<vmem>>, vector<1x32xf32>
    %18 = vector.broadcast %17 : vector<1x32xf32> to vector<72x32xf32>
    %19 = arith.addf %16, %18 : vector<72x32xf32>
    %c0_17 = arith.constant 0 : index
    %c0_18 = arith.constant 0 : index
    %20 = vector.load %arg8[%c0_17, %c0_18] : memref<72x32xf32, #tpu.memory_space<vmem>>, vector<72x32xf32>
    tpu.vector_store %arg8[%c0_17, %c0_18], %19 {strides = array<i32>} : memref<72x32xf32, #tpu.memory_space<vmem>>, vector<72x32xf32>,
    return
  }
  func.func @transform_0(%arg0: i32) -> (i32, i32) {
    %c0_i32 = arith.constant 0 : i32
    %c0_i32_0 = arith.constant 0 : i32
    return %arg0, %c0_i32 : i32, i32
  }
  func.func @transform_1(%arg0: i32) -> (i32, i32) {
    %c0_i32 = arith.constant 0 : i32
    %c0_i32_0 = arith.constant 0 : i32
    %c0_i32_1 = arith.constant 0 : i32
    return %c0_i32, %c0_i32_0 : i32, i32
  }
  func.func @transform_2(%arg0: i32) -> (i32, i32) {
    %c0_i32 = arith.constant 0 : i32
    %c0_i32_0 = arith.constant 0 : i32
    %c0_i32_1 = arith.constant 0 : i32
    return %c0_i32, %c0_i32_0 : i32, i32
  }
  func.func @transform_3(%arg0: i32) -> (i32, i32) {
    %c0_i32 = arith.constant 0 : i32
    %c0_i32_0 = arith.constant 0 : i32
    %c0_i32_1 = arith.constant 0 : i32
    return %c0_i32, %c0_i32_0 : i32, i32
  }
  func.func @transform_4(%arg0: i32) -> (i32, i32) {
    %c0_i32 = arith.constant 0 : i32
    %c0_i32_0 = arith.constant 0 : i32
    %c0_i32_1 = arith.constant 0 : i32
    return %c0_i32, %c0_i32_0 : i32, i32
  }
  func.func @transform_5(%arg0: i32) -> (i32, i32) {
    %c0_i32 = arith.constant 0 : i32
    %c0_i32_0 = arith.constant 0 : i32
    %c0_i32_1 = arith.constant 0 : i32
    return %c0_i32, %c0_i32_0 : i32, i32
  }
  func.func @transform_6(%arg0: i32) -> (i32, i32) {
    %c0_i32 = arith.constant 0 : i32
    %c0_i32_0 = arith.constant 0 : i32
    %c0_i32_1 = arith.constant 0 : i32
    return %c0_i32, %c0_i32_0 : i32, i32
  }
  func.func @transform_7(%arg0: i32) -> (i32, i32) {
    %c0_i32 = arith.constant 0 : i32
    %c0_i32_0 = arith.constant 0 : i32
    return %arg0, %c0_i32 : i32, i32
  }
}

</mosaic_0001>

<bundles_post_ra>
// kernel: state_encoder_forward.1
= control target key start
LH: loop header
LB: loop body
LE: loop exit
PB: predicated region body
PF: predicated region fallthrough
CT: control target
= control target key end

     0   :  { %vm41_vm0 = vcmask 130048   ;;  %vm207_vm1 = vcmask 523264   ;;  %vm279_vm2 = vcmask 261120   ;;  %s546_s1 = inlined_call_operand.vmem [shape: f32[16,128], index: 1, kind: input, shape index: {}]   ;;  %s547_s0 = inlined_call_operand.vmem [shape: f32[72,16], index: 0, kind: input, shape index: {}]   ;;  %s548_s2 = inlined_call_operand.vmem [shape: f32[1,128], index: 2, kind: input, shape index: {}]   ;;  %s549_s3 = inlined_call_operand.vmem [shape: f32[128,64], index: 3, kind: input, shape index: {}]   ;;  %s550_s4 = inlined_call_operand.vmem [shape: f32[1,64], index: 4, kind: input, shape index: {}]   ;;  %s551_s5 = inlined_call_operand.vmem [shape: f32[64,32], index: 5, kind: input, shape index: {}]   ;;  %s552_s6 = inlined_call_operand.vmem [shape: f32[1,32], index: 6, kind: input, shape index: {}]   ;;  %s553_s7 = inlined_call_operand.vmem [shape: f32[72,32], index: 7, kind: output, shape index: {}]  }
   0x1   :  { %v36_v0 = vld [vmem:[%s546_s1 + $0x8] sm:$0xff]  ;;  %v35_v1 = vld [vmem:[%s546_s1] sm:$0xff]  ;;  %v28_v4 = vld [vmem:[%s547_s0 + $0x10] sm:$0xff] }
   0x2   :  { %83 = vmatpush.msra.mxu0 %v36_v0  ;;  %v26_v2 = vld [vmem:[%s547_s0] sm:$0xff]  ;;  %v27_v3 = vld [vmem:[%s547_s0 + $0x8] sm:$0xff]  ;;  %v29_v5 = vld [vmem:[%s547_s0 + $0x18] sm:$0xff] }
   0x3   :  { %v30_v6 = vld [vmem:[%s547_s0 + $0x20] sm:$0xff]  ;;  %v137_v7 = vld [vmem:[%s549_s3 + $0x78] sm:$0xff]  ;;  %v136_v8 = vld [vmem:[%s549_s3 + $0x70] sm:$0xff] }
   0x4   :  { %84 = vmatpush.msra.mxu0 %v35_v1  ;;  %142 = vmatpush.msra.mxu1 %v137_v7  ;;  %v135_v9 = vld [vmem:[%s549_s3 + $0x68] sm:$0xff]  ;;  %v134_v10 = vld [vmem:[%s549_s3 + $0x60] sm:$0xff]  ;;  %v133_v12 = vld [vmem:[%s549_s3 + $0x58] sm:$0xff] }
   0x5   :  { %293 = vmatmul.msk.f32.vlgmr.msra.gmra.mxu0 %vm41_vm0, %v26_v2  ;;  %311 = vmatpush.msra.mxu3 %v137_v7  ;;  %v31_v11 = vld [vmem:[%s547_s0 + $0x28] sm:$0xff]  ;;  %v132_v13 = vld [vmem:[%s549_s3 + $0x50] sm:$0xff]  ;;  %v130_v15 = vld [vmem:[%s549_s3 + $0x40] sm:$0xff] }
   0x6   :  { %143 = vmatpush.msra.mxu1 %v136_v8  ;;  %v131_v14 = vld [vmem:[%s549_s3 + $0x48] sm:$0xff]  ;;  %v32_v16 = vld [vmem:[%s547_s0 + $0x30] sm:$0xff]  ;;  %v129_v17 = vld [vmem:[%s549_s3 + $0x38] sm:$0xff] }
   0x7   :  { %312 = vmatpush.msra.mxu3 %v136_v8  ;;  %v128_v18 = vld [vmem:[%s549_s3 + $0x30] sm:$0xff]  ;;  %v127_v19 = vld [vmem:[%s549_s3 + $0x28] sm:$0xff]  ;;  %v126_v20 = vld [vmem:[%s549_s3 + $0x20] sm:$0xff] }
   0x8   :  { %144 = vmatpush.msra.mxu1 %v135_v9  ;;  %v33_v21 = vld [vmem:[%s547_s0 + $0x38] sm:$0xff]  ;;  %v34_v23 = vld [vmem:[%s547_s0 + $0x40] sm:$0xff]  ;;  %v124_v24 = vld [vmem:[%s549_s3 + $0x10] sm:$0xff] }
   0x9   :  { %313 = vmatpush.msra.mxu3 %v135_v9  ;;  %v125_v22 = vld [vmem:[%s549_s3 + $0x18] sm:$0xff]  ;;  %v123_v25 = vld [vmem:[%s549_s3 + $0x8] sm:$0xff]  ;;  %v122_v26 = vld [vmem:[%s549_s3] sm:$0xff] }
   0xa   :  { %145 = vmatpush.msra.mxu1 %v134_v10  ;;  %v335_v27 = vld [vmem:[%s548_s2] ss:$0 sm:$0xff]  ;;  %v202_v43 = vld [vmem:[%s551_s5 + $0x38] sm:$0xff]  ;;  %v201_v44 = vld [vmem:[%s551_s5 + $0x30] sm:$0xff] }
   0xb   :  { %314 = vmatpush.msra.mxu3 %v134_v10  ;;  %243 = vmatpush.msra.mxu2 %v202_v43  ;;  %v200_v45 = vld [vmem:[%s551_s5 + $0x28] sm:$0xff]  ;;  %v199_v48 = vld [vmem:[%s551_s5 + $0x20] sm:$0xff]  ;;  %v198_v50 = vld [vmem:[%s551_s5 + $0x18] sm:$0xff] }
   0xc   :  { %146 = vmatpush.msra.mxu1 %v133_v12  ;;  %v197_v60 = vld [vmem:[%s551_s5 + $0x10] sm:$0xff]  ;;  %v196_v61 = vld [vmem:[%s551_s5 + $0x8] sm:$0xff]  ;;  %v195_v62 = vld [vmem:[%s551_s5] sm:$0xff] }
   0xd   :  { %294 = vmatmul.msk.f32.gmra.mxu0 %vm41_vm0, %v27_v3  ;;  %315 = vmatpush.msra.mxu3 %v133_v12  ;;  %v336_v63 = vld [vmem:[%s550_s4] ss:$0 sm:$0xff] }
   0xe   :  { %147 = vmatpush.msra.mxu1 %v132_v13  ;;  %244 = vmatpush.msra.mxu2 %v201_v44 }
   0xf   :  { %316 = vmatpush.msra.mxu3 %v132_v13 }
  0x10   :  { %148 = vmatpush.msra.mxu1 %v131_v14  ;;  %245 = vmatpush.msra.mxu2 %v200_v45 }
  0x11   :  { %317 = vmatpush.msra.mxu3 %v131_v14 }
  0x12   :  { %149 = vmatpush.msra.mxu1 %v130_v15  ;;  %246 = vmatpush.msra.mxu2 %v199_v48 }
  0x13   :  { %318 = vmatpush.msra.mxu3 %v130_v15 }
  0x14   :  { %150 = vmatpush.msra.mxu1 %v129_v17  ;;  %247 = vmatpush.msra.mxu2 %v198_v50 }
  0x15   :  { %295 = vmatmul.msk.f32.gmra.mxu0 %vm41_vm0, %v28_v4  ;;  %319 = vmatpush.msra.mxu3 %v129_v17 }
  0x16   :  { %151 = vmatpush.msra.mxu1 %v128_v18  ;;  %248 = vmatpush.msra.mxu2 %v197_v60 }
  0x17   :  { %320 = vmatpush.msra.mxu3 %v128_v18 }
  0x18   :  { %152 = vmatpush.msra.mxu1 %v127_v19  ;;  %249 = vmatpush.msra.mxu2 %v196_v61 }
  0x19   :  { %321 = vmatpush.msra.mxu3 %v127_v19 }
  0x1a   :  { %153 = vmatpush.msra.mxu1 %v126_v20  ;;  %250 = vmatpush.msra.mxu2 %v195_v62 }
  0x1b   :  { %322 = vmatpush.msra.mxu3 %v126_v20 }
  0x1c   :  { %154 = vmatpush.msra.mxu1 %v125_v22 }
  0x1d   :  { %296 = vmatmul.msk.f32.gmra.mxu0 %vm41_vm0, %v29_v5  ;;  %323 = vmatpush.msra.mxu3 %v125_v22 }
  0x1e   :  { %155 = vmatpush.msra.mxu1 %v124_v24 }
  0x1f   :  { %324 = vmatpush.msra.mxu3 %v124_v24 }
  0x20   :  { %156 = vmatpush.msra.mxu1 %v123_v25 }
  0x21   :  { %325 = vmatpush.msra.mxu3 %v123_v25 }
  0x22   :  { %157 = vmatpush.msra.mxu1 %v122_v26 }
  0x23   :  { %326 = vmatpush.msra.mxu3 %v122_v26 }
  0x25   :  { %297 = vmatmul.msk.f32.gmra.mxu0 %vm41_vm0, %v30_v6  ;;  %327 = vmatpush.msrb.mxu3 %v202_v43 }
  0x27   :  { %328 = vmatpush.msrb.mxu3 %v201_v44 }
  0x29   :  { %329 = vmatpush.msrb.mxu3 %v200_v45 }
  0x2b   :  { %330 = vmatpush.msrb.mxu3 %v199_v48 }
  0x2d   :  { %298 = vmatmul.msk.f32.gmra.mxu0 %vm41_vm0, %v31_v11  ;;  %331 = vmatpush.msrb.mxu3 %v198_v50 }
  0x2f   :  { %332 = vmatpush.msrb.mxu3 %v197_v60 }
  0x31   :  { %333 = vmatpush.msrb.mxu3 %v196_v61 }
  0x33   :  { %334 = vmatpush.msrb.mxu3 %v195_v62 }
  0x35   :  { %299 = vmatmul.msk.f32.gmra.mxu0 %vm41_vm0, %v32_v16 }
  0x3d   :  { %300 = vmatmul.msk.f32.gmra.mxu0 %vm41_vm0, %v33_v21 }
  0x45   :  { %301 = vmatmul.msk.f32.gmra.mxu0 %vm41_vm0, %v34_v23 }
  0x82   :  { %v86_v28 = vpop.f32.mrf.mxu0 }
  0x83   :  { %v87_v29 = vadd.f32 %v335_v27, %v86_v28 }
  0x85   :  { %v113_v30 = vmax.f32 %v87_v29, 0.0 }
  0x87   :  { %158 = vmatmul.f32.vlgmr.msra.gmra.mxu1 %v113_v30 }
  0x8a   :  { %v89_v31 = vpop.f32.mrf.mxu0 }
  0x8b   :  { %v90_v32 = vadd.f32 %v335_v27, %v89_v31 }
  0x8d   :  { %v114_v33 = vmax.f32 %v90_v32, 0.0 }
  0x8f   :  { %161 = vmatmul.f32.gmra.mxu1 %v114_v33 }
  0x92   :  { %v92_v34 = vpop.f32.mrf.mxu0 }
  0x93   :  { %v93_v35 = vadd.f32 %v335_v27, %v92_v34 }
  0x95   :  { %v115_v36 = vmax.f32 %v93_v35, 0.0 }
  0x97   :  { %164 = vmatmul.f32.gmra.mxu1 %v115_v36 }
  0x9a   :  { %v95_v37 = vpop.f32.mrf.mxu0 }
  0x9b   :  { %v96_v38 = vadd.f32 %v335_v27, %v95_v37 }
  0x9d   :  { %v116_v39 = vmax.f32 %v96_v38, 0.0 }
  0x9f   :  { %167 = vmatmul.f32.gmra.mxu1 %v116_v39 }
  0xa2   :  { %v98_v40 = vpop.f32.mrf.mxu0 }
  0xa3   :  { %v99_v41 = vadd.f32 %v335_v27, %v98_v40 }
  0xa5   :  { %v117_v42 = vmax.f32 %v99_v41, 0.0 }
  0xa7   :  { %170 = vmatmul.f32.gmra.mxu1 %v117_v42 }
  0xaa   :  { %v101_v46 = vpop.f32.mrf.mxu0 }
  0xab   :  { %v102_v47 = vadd.f32 %v335_v27, %v101_v46 }
  0xad   :  { %v118_v49 = vmax.f32 %v102_v47, 0.0 }
  0xaf   :  { %173 = vmatmul.f32.gmra.mxu1 %v118_v49 }
  0xb2   :  { %v104_v51 = vpop.f32.mrf.mxu0 }
  0xb3   :  { %v105_v52 = vadd.f32 %v335_v27, %v104_v51 }
  0xb5   :  { %v119_v53 = vmax.f32 %v105_v52, 0.0 }
  0xb7   :  { %176 = vmatmul.f32.vlgmr.msra.gmra.mxu3 %v119_v53 }
  0xba   :  { %v107_v54 = vpop.f32.mrf.mxu0 }
  0xbb   :  { %v108_v55 = vadd.f32 %v335_v27, %v107_v54 }
  0xbd   :  { %v120_v56 = vmax.f32 %v108_v55, 0.0 }
  0xbf   :  { %179 = vmatmul.f32.gmra.mxu3 %v120_v56 }
  0xc2   :  { %v110_v57 = vpop.f32.mrf.mxu0 }
  0xc3   :  { %v111_v58 = vadd.f32 %v335_v27, %v110_v57  ;;  %v337_v27 = vld [vmem:[%s552_s6] ss:$0 sm:$0xff] }
  0xc5   :  { %v121_v59 = vmax.f32 %v111_v58, 0.0 }
  0xc7   :  { %182 = vmatmul.f32.gmra.mxu3 %v121_v59 }
 0x104   :  { %v159_v0 = vpop.f32.mrf.mxu1 }
 0x105   :  { %v160_v1 = vadd.f32 %v336_v63, %v159_v0 }
 0x107   :  { %v186_v2 = vmax.f32 %v160_v1, 0.0 }
 0x109   :  { %302 = vmatmul.msk.f32.vlgmr.msra.gmra.mxu2 %vm207_vm1, %v186_v2 }
 0x10c   :  { %v162_v3 = vpop.f32.mrf.mxu1 }
 0x10d   :  { %v163_v4 = vadd.f32 %v336_v63, %v162_v3 }
 0x10f   :  { %v187_v5 = vmax.f32 %v163_v4, 0.0 }
 0x111   :  { %303 = vmatmul.msk.f32.gmra.mxu2 %vm207_vm1, %v187_v5 }
 0x114   :  { %v165_v6 = vpop.f32.mrf.mxu1 }
 0x115   :  { %v166_v7 = vadd.f32 %v336_v63, %v165_v6 }
 0x117   :  { %v188_v8 = vmax.f32 %v166_v7, 0.0 }
 0x119   :  { %304 = vmatmul.msk.f32.gmra.mxu2 %vm207_vm1, %v188_v8 }
 0x11c   :  { %v168_v9 = vpop.f32.mrf.mxu1 }
 0x11d   :  { %v169_v10 = vadd.f32 %v336_v63, %v168_v9 }
 0x11f   :  { %v189_v11 = vmax.f32 %v169_v10, 0.0 }
 0x121   :  { %305 = vmatmul.msk.f32.gmra.mxu2 %vm207_vm1, %v189_v11 }
 0x124   :  { %v171_v12 = vpop.f32.mrf.mxu1 }
 0x125   :  { %v172_v13 = vadd.f32 %v336_v63, %v171_v12 }
 0x127   :  { %v190_v14 = vmax.f32 %v172_v13, 0.0 }
 0x129   :  { %306 = vmatmul.msk.f32.gmra.mxu2 %vm207_vm1, %v190_v14 }
 0x12c   :  { %v174_v15 = vpop.f32.mrf.mxu1 }
 0x12d   :  { %v175_v16 = vadd.f32 %v336_v63, %v174_v15 }
 0x12f   :  { %v191_v17 = vmax.f32 %v175_v16, 0.0 }
 0x131   :  { %307 = vmatmul.msk.f32.gmra.mxu2 %vm207_vm1, %v191_v17 }
 0x13a   :  { %v177_v18 = vpop.f32.mrf.mxu3 }
 0x13b   :  { %v178_v19 = vadd.f32 %v336_v63, %v177_v18 }
 0x13d   :  { %v192_v20 = vmax.f32 %v178_v19, 0.0 }
 0x13f   :  { %308 = vmatmul.msk.f32.gmra.mxu2 %vm207_vm1, %v192_v20 }
 0x142   :  { %v180_v21 = vpop.f32.mrf.mxu3 }
 0x143   :  { %v181_v22 = vadd.f32 %v336_v63, %v180_v21 }
 0x145   :  { %v193_v23 = vmax.f32 %v181_v22, 0.0 }
 0x147   :  { %309 = vmatmul.msk.f32.gmra.mxu2 %vm207_vm1, %v193_v23 }
 0x14a   :  { %v183_v24 = vpop.f32.mrf.mxu3 }
 0x14b   :  { %v184_v25 = vadd.f32 %v336_v63, %v183_v24 }
 0x14d   :  { %v194_v26 = vmax.f32 %v184_v25, 0.0 }
 0x14f   :  { %310 = vmatmul.msk.f32.vlgmr.msrb.gmra.mxu3 %vm207_vm1, %v194_v26 }
 0x18c   :  { %v252_v28 = vpop.f32.mrf.mxu2 }
 0x18d   :  { %v253_v29 = vadd.f32 %v337_v27, %v252_v28 }
 0x18f   :  { %280 = vst.msk [vmem:[%s553_s7] sm:$0xff] %vm279_vm2, %v253_v29 }
 0x194   :  { %v255_v30 = vpop.f32.mrf.mxu2 }
 0x195   :  { %v256_v31 = vadd.f32 %v337_v27, %v255_v30 }
 0x197   :  { %281 = vst.msk [vmem:[%s553_s7 + $0x8] sm:$0xff] %vm279_vm2, %v256_v31 }
 0x19c   :  { %v258_v32 = vpop.f32.mrf.mxu2 }
 0x19d   :  { %v259_v33 = vadd.f32 %v337_v27, %v258_v32 }
 0x19f   :  { %282 = vst.msk [vmem:[%s553_s7 + $0x10] sm:$0xff] %vm279_vm2, %v259_v33 }
 0x1a4   :  { %v261_v34 = vpop.f32.mrf.mxu2 }
 0x1a5   :  { %v262_v35 = vadd.f32 %v337_v27, %v261_v34 }
 0x1a7   :  { %283 = vst.msk [vmem:[%s553_s7 + $0x18] sm:$0xff] %vm279_vm2, %v262_v35 }
 0x1ac   :  { %v264_v36 = vpop.f32.mrf.mxu2 }
 0x1ad   :  { %v265_v37 = vadd.f32 %v337_v27, %v264_v36 }
 0x1af   :  { %284 = vst.msk [vmem:[%s553_s7 + $0x20] sm:$0xff] %vm279_vm2, %v265_v37 }
 0x1b4   :  { %v267_v38 = vpop.f32.mrf.mxu2 }
 0x1b5   :  { %v268_v39 = vadd.f32 %v337_v27, %v267_v38 }
 0x1b7   :  { %285 = vst.msk [vmem:[%s553_s7 + $0x28] sm:$0xff] %vm279_vm2, %v268_v39 }
 0x1c2   :  { %v270_v40 = vpop.f32.mrf.mxu2 }
 0x1c3   :  { %v271_v41 = vadd.f32 %v337_v27, %v270_v40 }
 0x1c5   :  { %286 = vst.msk [vmem:[%s553_s7 + $0x30] sm:$0xff] %vm279_vm2, %v271_v41 }
 0x1ca   :  { %v273_v42 = vpop.f32.mrf.mxu2 }
 0x1cb   :  { %v274_v43 = vadd.f32 %v337_v27, %v273_v42 }
 0x1cd   :  { %287 = vst.msk [vmem:[%s553_s7 + $0x38] sm:$0xff] %vm279_vm2, %v274_v43 }
 0x1d2   :  { %v276_v44 = vpop.f32.mrf.mxu3 }
 0x1d3   :  { %v277_v45 = vadd.f32 %v337_v27, %v276_v44 }
 0x1d5   :  { %288 = vst.msk [vmem:[%s553_s7 + $0x40] sm:$0xff] %vm279_vm2, %v277_v45 }

</bundles_post_ra>
